<compile_context>
chip_gen: v5e
topology: v5e:2x2
jax: 0.10.0
libtpu: 0.0.40
codegen_flags: <defaults>
</compile_context>

<pallas_src>
import jax
import jax.numpy as jnp
from jax import lax
from jax.experimental import pallas as pl
from jax.experimental.pallas import tpu as pltpu

_BN_EPS = 1e-5
_CONTEXT_DILATIONS = ((1, 2, 4), (2, 4, 8), (2, 4, 8), (2, 4, 8))
_LANE = 128
_BM = 512                      # M-tile for the 1x1 GEMMs (fits v5e/v6e/v7x VMEM)
_VMEM_LIMIT = 48 * 1024 * 1024 # scoped VMEM headroom (< 64 MiB physical on v7x)


def _round_up(x, m):
    return ((x + m - 1) // m) * m


def _pad_channels(x, cp):
    c = x.shape[-1]
    if c == cp:
        return x
    return jnp.pad(x, ((0, 0),) * (x.ndim - 1) + ((0, cp - c),))


# ---------------------------------------------------------------------------
# Pallas kernels
# ---------------------------------------------------------------------------

def _mm_bias_kernel(x_ref, w_ref, b_ref, o_ref):
    # (bm, Cin) @ (Cin, Cout) + (1, Cout)
    acc = jnp.dot(x_ref[...], w_ref[...], preferred_element_type=jnp.float32)
    o_ref[...] = (acc + b_ref[...]).astype(o_ref.dtype)


def _mm_bias_residual_kernel(x_ref, w_ref, b_ref, r_ref, o_ref):
    # 1x1 conv + bias + residual add (fuses `x + part1` of forward()).
    acc = jnp.dot(x_ref[...], w_ref[...], preferred_element_type=jnp.float32)
    acc = acc + b_ref[...] + r_ref[...].astype(jnp.float32)
    o_ref[...] = acc.astype(o_ref.dtype)


def _make_conv3x3_kernel(H, W, d, add_residual):
    """Dilated 3x3 conv as 9 shifted GEMMs over the padded image, fused with
    folded-BN shift, ReLU and (optionally) a residual accumulate."""

    def kernel(xp_ref, w_ref, t_ref, *rest):
        if add_residual:
            r_ref, o_ref = rest
        else:
            (o_ref,) = rest
        cin = xp_ref.shape[-1]
        cout = w_ref.shape[-1]
        xp = xp_ref[...]                                   # (1, H+2d, W+2d, cin)
        acc = jnp.zeros((H * W, cout), jnp.float32)
        for ky in range(3):
            for kx in range(3):
                tap = lax.slice(
                    xp,
                    (0, ky * d, kx * d, 0),
                    (1, ky * d + H, kx * d + W, cin),
                ).reshape(H * W, cin)
                acc = acc + jnp.dot(tap, w_ref[ky * 3 + kx],
                                    preferred_element_type=jnp.float32)
        z = jnp.maximum(acc + t_ref[...], 0.0)             # folded bias+BN, ReLU
        if add_residual:
            z = z + r_ref[...].reshape(H * W, cout).astype(jnp.float32)
        o_ref[...] = z.reshape(1, H, W, cout).astype(o_ref.dtype)

    return kernel


# ---------------------------------------------------------------------------
# Wrappers
# ---------------------------------------------------------------------------

def conv1x1(x_nhwc, w, b, *, bm=_BM):
    N, H, W, Cin = x_nhwc.shape
    Cout = w.shape[1]
    M = N * H * W
    Mp = _round_up(M, bm)
    xm = x_nhwc.reshape(M, Cin)
    if Mp != M:
        xm = jnp.pad(xm, ((0, Mp - M), (0, 0)))
    out = pl.pallas_call(
        _mm_bias_kernel,
        out_shape=jax.ShapeDtypeStruct((Mp, Cout), jnp.bfloat16),
        grid=(Mp // bm,),
        in_specs=[
            pl.BlockSpec((bm, Cin), lambda i: (i, 0)),
            pl.BlockSpec((Cin, Cout), lambda i: (0, 0)),
            pl.BlockSpec((1, Cout), lambda i: (0, 0)),
        ],
        out_specs=pl.BlockSpec((bm, Cout), lambda i: (i, 0)),
        compiler_params=pltpu.CompilerParams(
            dimension_semantics=("parallel",),
            vmem_limit_bytes=_VMEM_LIMIT),
        cost_estimate=pl.CostEstimate(
            flops=2 * Mp * Cin * Cout, transcendentals=0,
            bytes_accessed=Mp * Cin * 2 + Cin * Cout * 2 + Cout * 4 + Mp * Cout * 2),
    )(xm, w, b)
    return out[:M].reshape(N, H, W, Cout)


def conv1x1_residual(x_nhwc, w, b, resid_nhwc, *, bm=_BM):
    N, H, W, Cin = x_nhwc.shape
    Cout = w.shape[1]
    M = N * H * W
    Mp = _round_up(M, bm)
    xm = x_nhwc.reshape(M, Cin)
    rm = resid_nhwc.reshape(M, Cout)
    if Mp != M:
        xm = jnp.pad(xm, ((0, Mp - M), (0, 0)))
        rm = jnp.pad(rm, ((0, Mp - M), (0, 0)))
    out = pl.pallas_call(
        _mm_bias_residual_kernel,
        out_shape=jax.ShapeDtypeStruct((Mp, Cout), jnp.float32),
        grid=(Mp // bm,),
        in_specs=[
            pl.BlockSpec((bm, Cin), lambda i: (i, 0)),
            pl.BlockSpec((Cin, Cout), lambda i: (0, 0)),
            pl.BlockSpec((1, Cout), lambda i: (0, 0)),
            pl.BlockSpec((bm, Cout), lambda i: (i, 0)),
        ],
        out_specs=pl.BlockSpec((bm, Cout), lambda i: (i, 0)),
        compiler_params=pltpu.CompilerParams(
            dimension_semantics=("parallel",),
            vmem_limit_bytes=_VMEM_LIMIT),
        cost_estimate=pl.CostEstimate(
            flops=2 * Mp * Cin * Cout, transcendentals=0,
            bytes_accessed=(Mp * Cin * 2 + Cin * Cout * 2 + Cout * 4
                            + Mp * Cout * 2 + Mp * Cout * 4)),
    )(xm, w, b, rm)
    return out[:M].reshape(N, H, W, Cout)


def conv3x3_bn_relu(x_nhwc, w9, t, d, residual=None):
    """Dilated 3x3 conv (stride 1, padding=dilation) + folded eval-BN + ReLU,
    with an optional fused residual add (context-sum accumulation)."""
    N, H, W, C = x_nhwc.shape
    Cout = w9.shape[-1]
    Hp, Wp = H + 2 * d, W + 2 * d
    xp = jnp.pad(x_nhwc, ((0, 0), (d, d), (d, d), (0, 0)))   # spatial halo only

    kernel = _make_conv3x3_kernel(H, W, d, residual is not None)
    in_specs = [
        pl.BlockSpec((1, Hp, Wp, C), lambda n: (n, 0, 0, 0)),
        pl.BlockSpec((9, C, Cout), lambda n: (0, 0, 0)),
        pl.BlockSpec((1, Cout), lambda n: (0, 0)),
    ]
    args = [xp, w9, t]
    if residual is not None:
        in_specs.append(pl.BlockSpec((1, H, W, Cout), lambda n: (n, 0, 0, 0)))
        args.append(residual)

    flops = 2 * N * H * W * 9 * C * Cout
    bytes_accessed = (xp.size * 2 + w9.size * 2 + t.size * 4
                      + N * H * W * Cout * 2 * (2 if residual is not None else 1))
    return pl.pallas_call(
        kernel,
        out_shape=jax.ShapeDtypeStruct((N, H, W, Cout), jnp.bfloat16),
        grid=(N,),
        in_specs=in_specs,
        out_specs=pl.BlockSpec((1, H, W, Cout), lambda n: (n, 0, 0, 0)),
        compiler_params=pltpu.CompilerParams(
            dimension_semantics=("parallel",),
            vmem_limit_bytes=_VMEM_LIMIT),
        cost_estimate=pl.CostEstimate(flops=flops, transcendentals=0,
                                      bytes_accessed=bytes_accessed),
    )(*args)


# ---------------------------------------------------------------------------
# Parameters: raw (PyTorch-equivalent, f32) + kernel-ready (folded/padded/bf16)
# ---------------------------------------------------------------------------

def init_aspp_params(key, in_channel, depth):
    c = in_channel // 4
    n_keys = 4 + 6 * sum(len(ds) for ds in _CONTEXT_DILATIONS)
    keys = iter(jax.random.split(key, n_keys))

    def nrm(shape, scale=0.1):
        return scale * jax.random.normal(next(keys), shape, jnp.float32)

    raw = {
        "conv1_w": nrm((in_channel, c)), "conv1_b": nrm((c,)),
        "conv2_w": nrm((c, depth)), "conv2_b": nrm((depth,)),
        "contexts": [],
    }
    for dils in _CONTEXT_DILATIONS:
        layers = []
        for d in dils:
            layers.append({
                "w": nrm((3, 3, c, c)),          # HWIO
                "b": nrm((c,)),
                "gamma": 1.0 + nrm((c,)),
                "beta": nrm((c,)),
                "mean": nrm((c,)),
                "var": 1.0 + 0.1 * jax.random.uniform(next(keys), (c,), jnp.float32),
                "d": d,
            })
        raw["contexts"].append(layers)
    return raw


def prepare_kernel_params(raw, in_channel, depth):
    assert depth == in_channel, "`x + part1` requires depth == in_channel"
    c = in_channel // 4
    cin_p = _round_up(in_channel, _LANE)
    c_p = _round_up(c, _LANE)
    d_p = _round_up(depth, _LANE)

    kp = {"cin_p": cin_p, "c_p": c_p, "d_p": d_p, "depth": depth}

    w1 = jnp.zeros((cin_p, c_p), jnp.float32).at[:in_channel, :c].set(raw["conv1_w"])
    kp["conv1_w"] = w1.astype(jnp.bfloat16)
    kp["conv1_b"] = jnp.zeros((1, c_p), jnp.float32).at[0, :c].set(raw["conv1_b"])

    w2 = jnp.zeros((c_p, d_p), jnp.float32).at[:c, :depth].set(raw["conv2_w"])
    kp["conv2_w"] = w2.astype(jnp.bfloat16)
    kp["conv2_b"] = jnp.zeros((1, d_p), jnp.float32).at[0, :depth].set(raw["conv2_b"])

    contexts = []
    for layers in raw["contexts"]:
        klayers = []
        for p in layers:
            s = p["gamma"] / jnp.sqrt(p["var"] + _BN_EPS)     # fold eval-BN
            wf = p["w"] * s                                   # scale output cols
            tf = p["b"] * s + p["beta"] - p["mean"] * s       # bias + shift
            wpad = jnp.zeros((3, 3, c_p, c_p), jnp.float32).at[:, :, :c, :c].set(wf)
            klayers.append({
                "w": wpad.reshape(9, c_p, c_p).astype(jnp.bfloat16),
                "t": jnp.zeros((1, c_p), jnp.float32).at[0, :c].set(tf),
                "d": p["d"],
            })
        contexts.append(klayers)
    kp["contexts"] = contexts
    return kp


# ---------------------------------------------------------------------------
# Forward
# ---------------------------------------------------------------------------

def aspp_forward(kp, x_nchw):
    depth = kp["depth"]
    x = jnp.transpose(x_nchw, (0, 2, 3, 1))                    # NCHW -> NHWC
    x_p = _pad_channels(x, kp["cin_p"]).astype(jnp.bfloat16)   # lane-dense bf16

    img = conv1x1(x_p, kp["conv1_w"], kp["conv1_b"])           # (N,H,W,c_p)

    ctx_sum = None
    for layers in kp["contexts"]:                              # context1..4
        h = img
        last = len(layers) - 1
        for li, p in enumerate(layers):
            resid = ctx_sum if (li == last and ctx_sum is not None) else None
            h = conv3x3_bn_relu(h, p["w"], p["t"], p["d"], residual=resid)
        ctx_sum = h                                            # running sum fused in

    # part1 = conv2(sum of contexts); out = dropout(x + part1) (eval: identity)
    out = conv1x1_residual(ctx_sum, kp["conv2_w"], kp["conv2_b"], x_p)  # f32
    out = out[..., :depth]
    return jnp.transpose(out, (0, 3, 1, 2))                    # NHWC -> NCHW


# ---------------------------------------------------------------------------
# Pure-JAX f32 reference (faithful to the PyTorch module, for correctness)
# ---------------------------------------------------------------------------

def _ref_conv1x1(x, w, b):
    return jnp.einsum("nhwc,cd->nhwd", x, w) + b


def _ref_conv3x3_bn_relu(x, p):
    d = p["d"]
    y = lax.conv_general_dilated(
        x, p["w"], window_strides=(1, 1), padding=[(d, d), (d, d)],
        rhs_dilation=(d, d), dimension_numbers=("NHWC", "HWIO", "NHWC")) + p["b"]
    y = (y - p["mean"]) / jnp.sqrt(p["var"] + _BN_EPS) * p["gamma"] + p["beta"]
    return jnp.maximum(y, 0.0)


def aspp_reference(raw, x_nchw):
    x = jnp.transpose(x_nchw, (0, 2, 3, 1))
    img = _ref_conv1x1(x, raw["conv1_w"], raw["conv1_b"])
    ctx_sum = None
    for layers in raw["contexts"]:
        h = img
        for p in layers:
            h = _ref_conv3x3_bn_relu(h, p)
        ctx_sum = h if ctx_sum is None else ctx_sum + h
    out = _ref_conv1x1(ctx_sum, raw["conv2_w"], raw["conv2_b"]) + x
    return jnp.transpose(out, (0, 3, 1, 2))


if __name__ == "__main__":
    key = jax.random.PRNGKey(0)
    k_param, k_x = jax.random.split(key)

    # depth == in_channel is required by `x + part1` in the PyTorch forward.
    in_channel, depth = 8, 8
    N, H, W = 2, 16, 16

    raw = init_aspp_params(k_param, in_channel, depth)
    kparams = prepare_kernel_params(raw, in_channel, depth)
    x = jax.random.normal(k_x, (N, in_channel, H, W), jnp.float32)

    out = jax.block_until_ready(aspp_forward(kparams, x))
    ref = jax.block_until_ready(aspp_reference(raw, x))

    assert out.shape == (N, depth, H, W), out.shape
    max_err = float(jnp.max(jnp.abs(out - ref)))
    assert jnp.allclose(out, ref, atol=3e-2, rtol=3e-2), max_err

    print("KERNEL_OK")
</pallas_src>

<mosaic_0001>
module attributes {stable_mosaic.version = 11 : i64} {
  func.func @_mm_bias_kernel(%arg0: i32, %arg1: memref<512x128xbf16, #tpu.memory_space<vmem>>, %arg2: memref<128x128xbf16, #tpu.memory_space<vmem>>, %arg3: memref<1x128xf32, #tpu.memory_space<vmem>>, %arg4: memref<512x128xbf16, #tpu.memory_space<vmem>>) attributes {dimension_semantics = [#tpu.dimension_semantics<parallel>], iteration_bounds = array<i64: 1>, scalar_prefetch = 0 : i64, scratch_operands = 0 : i64, tpu.core_type = #tpu.core_type<tc>, window_params = [{transform_indices = @transform_0, window_bounds = array<i64: 512, 128>}, {pipeline_mode = #tpu.pipeline_mode<synchronous>, transform_indices = @transform_1, window_bounds = array<i64: 128, 128>}, {pipeline_mode = #tpu.pipeline_mode<synchronous>, transform_indices = @transform_2, window_bounds = array<i64: 1, 128>}, {transform_indices = @transform_3, window_bounds = array<i64: 512, 128>}]} {
    %c0 = arith.constant 0 : index
    %c0_0 = arith.constant 0 : index
    %0 = vector.load %arg1[%c0, %c0_0] : memref<512x128xbf16, #tpu.memory_space<vmem>>, vector<512x128xbf16>
    %c0_1 = arith.constant 0 : index
    %c0_2 = arith.constant 0 : index
    %1 = vector.load %arg2[%c0_1, %c0_2] : memref<128x128xbf16, #tpu.memory_space<vmem>>, vector<128x128xbf16>
    %cst = arith.constant dense<0.000000e+00> : vector<512x128xf32>
    %2 = tpu.matmul %0, %1, %cst {dimension_numbers = #tpu.dot_dimension_numbers<[1], [0], [0], [1], [0, 0, 1, 1], [], []>} : vector<512x128xbf16>, vector<128x128xbf16>, vector<512x128xf32> -> vector<512x128xf32>
    %c0_3 = arith.constant 0 : index
    %c0_4 = arith.constant 0 : index
    %3 = vector.load %arg3[%c0_3, %c0_4] : memref<1x128xf32, #tpu.memory_space<vmem>>, vector<1x128xf32>
    %4 = vector.broadcast %3 : vector<1x128xf32> to vector<512x128xf32>
    %5 = arith.addf %2, %4 : vector<512x128xf32>
    %6 = arith.truncf %5 : vector<512x128xf32> to vector<512x128xbf16>
    %c0_5 = arith.constant 0 : index
    %c0_6 = arith.constant 0 : index
    %7 = vector.load %arg4[%c0_5, %c0_6] : memref<512x128xbf16, #tpu.memory_space<vmem>>, vector<512x128xbf16>
    tpu.vector_store %arg4[%c0_5, %c0_6], %6 {strides = array<i32>} : memref<512x128xbf16, #tpu.memory_space<vmem>>, vector<512x128xbf16>,
    return
  }
  func.func @transform_0(%arg0: i32) -> (i32, i32) {
    %c0_i32 = arith.constant 0 : i32
    %c0_i32_0 = arith.constant 0 : i32
    return %arg0, %c0_i32 : i32, i32
  }
  func.func @transform_1(%arg0: i32) -> (i32, i32) {
    %c0_i32 = arith.constant 0 : i32
    %c0_i32_0 = arith.constant 0 : i32
    %c0_i32_1 = arith.constant 0 : i32
    return %c0_i32, %c0_i32_0 : i32, i32
  }
  func.func @transform_2(%arg0: i32) -> (i32, i32) {
    %c0_i32 = arith.constant 0 : i32
    %c0_i32_0 = arith.constant 0 : i32
    %c0_i32_1 = arith.constant 0 : i32
    return %c0_i32, %c0_i32_0 : i32, i32
  }
  func.func @transform_3(%arg0: i32) -> (i32, i32) {
    %c0_i32 = arith.constant 0 : i32
    %c0_i32_0 = arith.constant 0 : i32
    return %arg0, %c0_i32 : i32, i32
  }
}

</mosaic_0001>

<bundles_post_ra>
// kernel: tpu_custom_call.1
= control target key start
LH: loop header
LB: loop body
LE: loop exit
PB: predicated region body
PF: predicated region fallthrough
CT: control target
= control target key end

     0   :  { %8 = vsyncpa [#allocation3], 0  ;;  %s1299_s0 = inlined_call_operand.hbm [shape: bf16[512,128], index: 0, kind: input, shape index: {}]   ;;  %s1300_s1 = inlined_call_operand.hbm [shape: bf16[128,128], index: 1, kind: input, shape index: {}]   ;;  %s1301_s2 = inlined_call_operand.vmem [shape: f32[1,128], index: 2, kind: input, shape index: {}]   ;;  %s1302_s3 = inlined_call_operand.hbm [shape: bf16[512,128], index: 3, kind: output, shape index: {}]  }
   0x1   :  { %9 = vsyncpa [#allocation6], 0 }
   0x2   :  { %10 = vsyncpa [#allocation4], 0  ;;  %s15_s14 = sshll.u32 %s1299_s0, 4  ;;  %s1187_s15 = smov [#allocation2]   ;;  %s16_s14 = int_to_ptr.hbm [resolvable:$true] %s15_s14 }
   0x3   :  { %s17_s16 = sshll.u32 %s1187_s15, 4  ;;  %s28_s19 = sshll.u32 %s1300_s1, 4  ;;  %s18_s16 = int_to_ptr.vmem [resolvable:$true] %s17_s16  ;;  %s29_s19 = int_to_ptr.hbm [resolvable:$true] %s28_s19 }
   0x4   :  { %s1188_s20 = smov 64   ;;  %s1189_s21 = smov 4  }
   0x5   :  { %23 = dma.hbm_to_vmem [thread:$0]  %s16_s14, 4096, %s18_s16, [#allocation3], %s1188_s20, %s1188_s20, %s1189_s21  }
   0x6   :  { %s1190_s22 = smov [#allocation5]  }
   0x7   :  { %s30_s23 = sshll.u32 %s1190_s22, 4  ;;  %s31_s23 = int_to_ptr.vmem [resolvable:$true] %s30_s23 }
   0x8   :  { %36 = dma.hbm_to_vmem [thread:$0]  %s29_s19, 1024, %s31_s23, [#allocation6], %s1188_s20, %s1188_s20, %s1189_s21  }
   0x9   :  { %1181 = dma.done.wait [#allocation3], 4096  }
   0xa   :  { %1182 = vsyncadd [#allocation3], 4294963200 }
   0xb   :  { %1183 = dma.done.wait [#allocation6], 1024  }
   0xc   :  { %1184 = vsyncadd [#allocation6], 4294966272  ;;  %v887_v0 = vld [vmem:[#allocation5 + $0x38] sm:$0xff]  ;;  %v886_v1 = vld [vmem:[#allocation5 + $0x30] sm:$0xff]  ;;  %s674_s27 = sshll.u32 %s1302_s3, 4  ;;  %s675_s27 = int_to_ptr.hbm [resolvable:$true] %s674_s27 }
   0xd   :  { %371 = vmatpush.bf16.msra.mxu0 %v887_v0  ;;  %1079 = vmatpush.bf16.msra.mxu1 %v887_v0  ;;  %v885_v2 = vld [vmem:[#allocation5 + $0x28] sm:$0xff]  ;;  %v884_v3 = vld [vmem:[#allocation5 + $0x20] sm:$0xff]  ;;  %v883_v4 = vld [vmem:[#allocation5 + $0x18] sm:$0xff] }
   0xe   :  { %1080 = vmatpush.bf16.msra.mxu2 %v887_v0  ;;  %1081 = vmatpush.bf16.msra.mxu3 %v887_v0  ;;  %v882_v5 = vld [vmem:[#allocation5 + $0x10] sm:$0xff]  ;;  %v881_v6 = vld [vmem:[#allocation5 + $0x8] sm:$0xff]  ;;  %v880_v7 = vld [vmem:[#allocation5] sm:$0xff] }
   0xf   :  { %v848_v8 = vld [vmem:[#allocation2] sm:$0xff]  ;;  %v849_v12 = vld [vmem:[#allocation2 + $0x8] sm:$0xff]  ;;  %v850_v16 = vld [vmem:[#allocation2 + $0x10] sm:$0xff] }
  0x10   :  { %v856_v9 = vld [vmem:[#allocation2 + $0x40] sm:$0xff]  ;;  %v857_v13 = vld [vmem:[#allocation2 + $0x48] sm:$0xff]  ;;  %v858_v17 = vld [vmem:[#allocation2 + $0x50] sm:$0xff] }
  0x11   :  { %372 = vmatpush.bf16.msra.mxu0 %v886_v1  ;;  %1082 = vmatpush.bf16.msra.mxu1 %v886_v1  ;;  %v864_v10 = vld [vmem:[#allocation2 + $0x80] sm:$0xff]  ;;  %v865_v14 = vld [vmem:[#allocation2 + $0x88] sm:$0xff]  ;;  %v866_v18 = vld [vmem:[#allocation2 + $0x90] sm:$0xff] }
  0x12   :  { %1083 = vmatpush.bf16.msra.mxu2 %v886_v1  ;;  %1084 = vmatpush.bf16.msra.mxu3 %v886_v1  ;;  %v872_v11 = vld [vmem:[#allocation2 + $0xc0] sm:$0xff]  ;;  %v873_v15 = vld [vmem:[#allocation2 + $0xc8] sm:$0xff]  ;;  %v874_v19 = vld [vmem:[#allocation2 + $0xd0] sm:$0xff] }
  0x13   :  { %v851_v20 = vld [vmem:[#allocation2 + $0x18] sm:$0xff]  ;;  %v852_v24 = vld [vmem:[#allocation2 + $0x20] sm:$0xff]  ;;  %v853_v28 = vld [vmem:[#allocation2 + $0x28] sm:$0xff] }
  0x14   :  { %v859_v21 = vld [vmem:[#allocation2 + $0x58] sm:$0xff]  ;;  %v860_v25 = vld [vmem:[#allocation2 + $0x60] sm:$0xff]  ;;  %v861_v29 = vld [vmem:[#allocation2 + $0x68] sm:$0xff] }
  0x15   :  { %373 = vmatpush.bf16.msra.mxu0 %v885_v2  ;;  %1085 = vmatpush.bf16.msra.mxu1 %v885_v2  ;;  %v867_v22 = vld [vmem:[#allocation2 + $0x98] sm:$0xff]  ;;  %v868_v26 = vld [vmem:[#allocation2 + $0xa0] sm:$0xff]  ;;  %v869_v30 = vld [vmem:[#allocation2 + $0xa8] sm:$0xff] }
  0x16   :  { %1086 = vmatpush.bf16.msra.mxu2 %v885_v2  ;;  %1087 = vmatpush.bf16.msra.mxu3 %v885_v2  ;;  %v875_v23 = vld [vmem:[#allocation2 + $0xd8] sm:$0xff]  ;;  %v876_v27 = vld [vmem:[#allocation2 + $0xe0] sm:$0xff]  ;;  %v877_v31 = vld [vmem:[#allocation2 + $0xe8] sm:$0xff] }
  0x17   :  { %v854_v32 = vld [vmem:[#allocation2 + $0x30] sm:$0xff]  ;;  %v855_v36 = vld [vmem:[#allocation2 + $0x38] sm:$0xff]  ;;  %v1227_v42 = vld [vmem:[%s1301_s2] ss:$0 sm:$0xff]  ;;  %s1191_s2 = smov [#allocation7]  }
  0x18   :  { %v862_v33 = vld [vmem:[#allocation2 + $0x70] sm:$0xff]  ;;  %v863_v37 = vld [vmem:[#allocation2 + $0x78] sm:$0xff]  ;;  %s672_s24 = sshll.u32 %s1191_s2, 4  ;;  %s673_s24 = int_to_ptr.vmem [resolvable:$true] %s672_s24 }
  0x19   :  { %374 = vmatpush.bf16.msra.mxu0 %v884_v3  ;;  %1088 = vmatpush.bf16.msra.mxu1 %v884_v3  ;;  %v870_v34 = vld [vmem:[#allocation2 + $0xb0] sm:$0xff]  ;;  %v871_v38 = vld [vmem:[#allocation2 + $0xb8] sm:$0xff] }
  0x1a   :  { %1089 = vmatpush.bf16.msra.mxu2 %v884_v3  ;;  %1090 = vmatpush.bf16.msra.mxu3 %v884_v3  ;;  %v878_v35 = vld [vmem:[#allocation2 + $0xf0] sm:$0xff]  ;;  %v879_v39 = vld [vmem:[#allocation2 + $0xf8] sm:$0xff] }
  0x1d   :  { %375 = vmatpush.bf16.msra.mxu0 %v883_v4  ;;  %1091 = vmatpush.bf16.msra.mxu1 %v883_v4 }
  0x1e   :  { %1092 = vmatpush.bf16.msra.mxu2 %v883_v4  ;;  %1093 = vmatpush.bf16.msra.mxu3 %v883_v4 }
  0x21   :  { %376 = vmatpush.bf16.msra.mxu0 %v882_v5  ;;  %1094 = vmatpush.bf16.msra.mxu1 %v882_v5 }
  0x22   :  { %1095 = vmatpush.bf16.msra.mxu2 %v882_v5  ;;  %1096 = vmatpush.bf16.msra.mxu3 %v882_v5 }
  0x25   :  { %377 = vmatpush.bf16.msra.mxu0 %v881_v6  ;;  %1097 = vmatpush.bf16.msra.mxu1 %v881_v6 }
  0x26   :  { %1098 = vmatpush.bf16.msra.mxu2 %v881_v6  ;;  %1099 = vmatpush.bf16.msra.mxu3 %v881_v6 }
  0x29   :  { %378 = vmatpush.bf16.msra.mxu0 %v880_v7  ;;  %1100 = vmatpush.bf16.msra.mxu1 %v880_v7 }
  0x2a   :  { %1101 = vmatpush.bf16.msra.mxu2 %v880_v7  ;;  %1102 = vmatpush.bf16.msra.mxu3 %v880_v7 }
  0x2c   :  { %379 = vmatmul.bf16.vlgmr.msra.gmra.mxu0 %v848_v8  ;;  %419 = vmatmul.bf16.vlgmr.msra.gmra.mxu1 %v856_v9 }
  0x2d   :  { %459 = vmatmul.bf16.vlgmr.msra.gmra.mxu2 %v864_v10  ;;  %499 = vmatmul.bf16.vlgmr.msra.gmra.mxu3 %v872_v11 }
  0x3c   :  { %384 = vmatmul.bf16.gmra.mxu0 %v849_v12  ;;  %424 = vmatmul.bf16.gmra.mxu1 %v857_v13 }
  0x3d   :  { %464 = vmatmul.bf16.gmra.mxu2 %v865_v14  ;;  %504 = vmatmul.bf16.gmra.mxu3 %v873_v15 }
  0x4c   :  { %389 = vmatmul.bf16.gmra.mxu0 %v850_v16  ;;  %429 = vmatmul.bf16.gmra.mxu1 %v858_v17 }
  0x4d   :  { %469 = vmatmul.bf16.gmra.mxu2 %v866_v18  ;;  %509 = vmatmul.bf16.gmra.mxu3 %v874_v19 }
  0x5c   :  { %394 = vmatmul.bf16.gmra.mxu0 %v851_v20  ;;  %434 = vmatmul.bf16.gmra.mxu1 %v859_v21 }
  0x5d   :  { %474 = vmatmul.bf16.gmra.mxu2 %v867_v22  ;;  %514 = vmatmul.bf16.gmra.mxu3 %v875_v23 }
  0x6c   :  { %399 = vmatmul.bf16.gmra.mxu0 %v852_v24  ;;  %439 = vmatmul.bf16.gmra.mxu1 %v860_v25 }
  0x6d   :  { %479 = vmatmul.bf16.gmra.mxu2 %v868_v26  ;;  %519 = vmatmul.bf16.gmra.mxu3 %v876_v27 }
  0x7c   :  { %404 = vmatmul.bf16.gmra.mxu0 %v853_v28  ;;  %444 = vmatmul.bf16.gmra.mxu1 %v861_v29 }
  0x7d   :  { %484 = vmatmul.bf16.gmra.mxu2 %v869_v30  ;;  %524 = vmatmul.bf16.gmra.mxu3 %v877_v31 }
  0x8c   :  { %409 = vmatmul.bf16.gmra.mxu0 %v854_v32  ;;  %449 = vmatmul.bf16.gmra.mxu1 %v862_v33 }
  0x8d   :  { %489 = vmatmul.bf16.gmra.mxu2 %v870_v34  ;;  %529 = vmatmul.bf16.gmra.mxu3 %v878_v35 }
  0x9c   :  { %414 = vmatmul.bf16.gmra.mxu0 %v855_v36  ;;  %454 = vmatmul.bf16.gmra.mxu1 %v863_v37 }
  0x9d   :  { %494 = vmatmul.bf16.gmra.mxu2 %v871_v38  ;;  %534 = vmatmul.bf16.gmra.mxu3 %v879_v39 }
  0xa9   :  { %v380_v40 = vpop.f32.mrf.mxu0  ;;  %v420_v41 = vpop.f32.mrf.mxu1 }
  0xaa   :  { %v381_v47 = vadd.f32 %v1227_v42, %v380_v40  ;;  %v421_v48 = vadd.f32 %v1227_v42, %v420_v41 }
  0xb0   :  { %v460_v43 = vpop.f32.mrf.mxu2  ;;  %v500_v44 = vpop.f32.mrf.mxu3 }
  0xb1   :  { %v382_v45 = vpop.f32.mrf.mxu0  ;;  %v422_v46 = vpop.f32.mrf.mxu1  ;;  %v461_v55 = vadd.f32 %v1227_v42, %v460_v43  ;;  %v501_v56 = vadd.f32 %v1227_v42, %v500_v44 }
  0xb2   :  { %v383_v49 = vadd.f32 %v1227_v42, %v382_v45  ;;  %v423_v50 = vadd.f32 %v1227_v42, %v422_v46 }
  0xb4   :  { %v891_v51 = vpack.c.bf16 %v383_v49, %v381_v47  ;;  %v931_v52 = vpack.c.bf16 %v423_v50, %v421_v48 }
  0xb6   :  { %892 = vst [vmem:[#allocation7] sm:$0xff] %v891_v51  }
  0xb7   :  { %1055 = vst [vmem:[#allocation7 + $0x40] sm:$0xff] %v931_v52  }
  0xb8   :  { %v462_v53 = vpop.f32.mrf.mxu2  ;;  %v502_v54 = vpop.f32.mrf.mxu3 }
  0xb9   :  { %v463_v57 = vadd.f32 %v1227_v42, %v462_v53  ;;  %v503_v58 = vadd.f32 %v1227_v42, %v502_v54  ;;  %v385_v59 = vpop.f32.mrf.mxu0  ;;  %v425_v60 = vpop.f32.mrf.mxu1 }
  0xba   :  { %v386_v3 = vadd.f32 %v1227_v42, %v385_v59  ;;  %v426_v4 = vadd.f32 %v1227_v42, %v425_v60 }
  0xbb   :  { %v971_v61 = vpack.c.bf16 %v463_v57, %v461_v55  ;;  %v1011_v62 = vpack.c.bf16 %v503_v58, %v501_v56 }
  0xbd   :  { %1063 = vst [vmem:[#allocation7 + $0x80] sm:$0xff] %v971_v61  }
  0xbe   :  { %1071 = vst [vmem:[#allocation7 + $0xc0] sm:$0xff] %v1011_v62  }
  0xc0   :  { %v465_v63 = vpop.f32.mrf.mxu2  ;;  %v505_v0 = vpop.f32.mrf.mxu3 }
  0xc1   :  { %v387_v1 = vpop.f32.mrf.mxu0  ;;  %v427_v2 = vpop.f32.mrf.mxu1  ;;  %v466_v11 = vadd.f32 %v1227_v42, %v465_v63  ;;  %v506_v12 = vadd.f32 %v1227_v42, %v505_v0 }
  0xc2   :  { %v388_v5 = vadd.f32 %v1227_v42, %v387_v1  ;;  %v428_v6 = vadd.f32 %v1227_v42, %v427_v2 }
  0xc4   :  { %v896_v7 = vpack.c.bf16 %v388_v5, %v386_v3  ;;  %v936_v8 = vpack.c.bf16 %v428_v6, %v426_v4 }
  0xc6   :  { %1048 = vst [vmem:[#allocation7 + $0x8] sm:$0xff] %v896_v7  }
  0xc7   :  { %1056 = vst [vmem:[#allocation7 + $0x48] sm:$0xff] %v936_v8  }
  0xc8   :  { %v467_v9 = vpop.f32.mrf.mxu2  ;;  %v507_v10 = vpop.f32.mrf.mxu3 }
  0xc9   :  { %v468_v13 = vadd.f32 %v1227_v42, %v467_v9  ;;  %v508_v14 = vadd.f32 %v1227_v42, %v507_v10  ;;  %v390_v15 = vpop.f32.mrf.mxu0  ;;  %v430_v16 = vpop.f32.mrf.mxu1 }
  0xca   :  { %v391_v23 = vadd.f32 %v1227_v42, %v390_v15  ;;  %v431_v24 = vadd.f32 %v1227_v42, %v430_v16 }
  0xcb   :  { %v976_v17 = vpack.c.bf16 %v468_v13, %v466_v11  ;;  %v1016_v18 = vpack.c.bf16 %v508_v14, %v506_v12 }
  0xcd   :  { %1064 = vst [vmem:[#allocation7 + $0x88] sm:$0xff] %v976_v17  }
  0xce   :  { %1072 = vst [vmem:[#allocation7 + $0xc8] sm:$0xff] %v1016_v18  }
  0xd0   :  { %v470_v19 = vpop.f32.mrf.mxu2  ;;  %v510_v20 = vpop.f32.mrf.mxu3 }
  0xd1   :  { %v392_v21 = vpop.f32.mrf.mxu0  ;;  %v432_v22 = vpop.f32.mrf.mxu1  ;;  %v471_v31 = vadd.f32 %v1227_v42, %v470_v19  ;;  %v511_v32 = vadd.f32 %v1227_v42, %v510_v20 }
  0xd2   :  { %v393_v25 = vadd.f32 %v1227_v42, %v392_v21  ;;  %v433_v26 = vadd.f32 %v1227_v42, %v432_v22 }
  0xd4   :  { %v901_v27 = vpack.c.bf16 %v393_v25, %v391_v23  ;;  %v941_v28 = vpack.c.bf16 %v433_v26, %v431_v24 }
  0xd6   :  { %1049 = vst [vmem:[#allocation7 + $0x10] sm:$0xff] %v901_v27  }
  0xd7   :  { %1057 = vst [vmem:[#allocation7 + $0x50] sm:$0xff] %v941_v28  }
  0xd8   :  { %v472_v29 = vpop.f32.mrf.mxu2  ;;  %v512_v30 = vpop.f32.mrf.mxu3 }
  0xd9   :  { %v473_v33 = vadd.f32 %v1227_v42, %v472_v29  ;;  %v513_v34 = vadd.f32 %v1227_v42, %v512_v30  ;;  %v395_v35 = vpop.f32.mrf.mxu0  ;;  %v435_v36 = vpop.f32.mrf.mxu1 }
  0xda   :  { %v396_v44 = vadd.f32 %v1227_v42, %v395_v35  ;;  %v436_v45 = vadd.f32 %v1227_v42, %v435_v36 }
  0xdb   :  { %v981_v37 = vpack.c.bf16 %v473_v33, %v471_v31  ;;  %v1021_v38 = vpack.c.bf16 %v513_v34, %v511_v32 }
  0xdd   :  { %1065 = vst [vmem:[#allocation7 + $0x90] sm:$0xff] %v981_v37  }
  0xde   :  { %1073 = vst [vmem:[#allocation7 + $0xd0] sm:$0xff] %v1021_v38  }
  0xe0   :  { %v475_v39 = vpop.f32.mrf.mxu2  ;;  %v515_v40 = vpop.f32.mrf.mxu3 }
  0xe1   :  { %v397_v41 = vpop.f32.mrf.mxu0  ;;  %v437_v43 = vpop.f32.mrf.mxu1  ;;  %v476_v52 = vadd.f32 %v1227_v42, %v475_v39  ;;  %v516_v53 = vadd.f32 %v1227_v42, %v515_v40 }
  0xe2   :  { %v398_v46 = vadd.f32 %v1227_v42, %v397_v41  ;;  %v438_v47 = vadd.f32 %v1227_v42, %v437_v43 }
  0xe4   :  { %v906_v48 = vpack.c.bf16 %v398_v46, %v396_v44  ;;  %v946_v49 = vpack.c.bf16 %v438_v47, %v436_v45 }
  0xe6   :  { %1050 = vst [vmem:[#allocation7 + $0x18] sm:$0xff] %v906_v48  }
  0xe7   :  { %1058 = vst [vmem:[#allocation7 + $0x58] sm:$0xff] %v946_v49  }
  0xe8   :  { %v477_v50 = vpop.f32.mrf.mxu2  ;;  %v517_v51 = vpop.f32.mrf.mxu3 }
  0xe9   :  { %v478_v54 = vadd.f32 %v1227_v42, %v477_v50  ;;  %v518_v55 = vadd.f32 %v1227_v42, %v517_v51  ;;  %v400_v56 = vpop.f32.mrf.mxu0  ;;  %v440_v57 = vpop.f32.mrf.mxu1 }
  0xea   :  { %v401_v0 = vadd.f32 %v1227_v42, %v400_v56  ;;  %v441_v1 = vadd.f32 %v1227_v42, %v440_v57 }
  0xeb   :  { %v986_v58 = vpack.c.bf16 %v478_v54, %v476_v52  ;;  %v1026_v59 = vpack.c.bf16 %v518_v55, %v516_v53 }
  0xed   :  { %1066 = vst [vmem:[#allocation7 + $0x98] sm:$0xff] %v986_v58  }
  0xee   :  { %1074 = vst [vmem:[#allocation7 + $0xd8] sm:$0xff] %v1026_v59  }
  0xf0   :  { %v480_v60 = vpop.f32.mrf.mxu2  ;;  %v520_v61 = vpop.f32.mrf.mxu3 }
  0xf1   :  { %v402_v62 = vpop.f32.mrf.mxu0  ;;  %v442_v63 = vpop.f32.mrf.mxu1  ;;  %v481_v8 = vadd.f32 %v1227_v42, %v480_v60  ;;  %v521_v9 = vadd.f32 %v1227_v42, %v520_v61 }
  0xf2   :  { %v403_v2 = vadd.f32 %v1227_v42, %v402_v62  ;;  %v443_v3 = vadd.f32 %v1227_v42, %v442_v63 }
  0xf4   :  { %v911_v4 = vpack.c.bf16 %v403_v2, %v401_v0  ;;  %v951_v5 = vpack.c.bf16 %v443_v3, %v441_v1 }
  0xf6   :  { %1051 = vst [vmem:[#allocation7 + $0x20] sm:$0xff] %v911_v4  }
  0xf7   :  { %1059 = vst [vmem:[#allocation7 + $0x60] sm:$0xff] %v951_v5  }
  0xf8   :  { %v482_v6 = vpop.f32.mrf.mxu2  ;;  %v522_v7 = vpop.f32.mrf.mxu3 }
  0xf9   :  { %v483_v10 = vadd.f32 %v1227_v42, %v482_v6  ;;  %v523_v11 = vadd.f32 %v1227_v42, %v522_v7  ;;  %v405_v12 = vpop.f32.mrf.mxu0  ;;  %v445_v13 = vpop.f32.mrf.mxu1 }
  0xfa   :  { %v406_v20 = vadd.f32 %v1227_v42, %v405_v12  ;;  %v446_v21 = vadd.f32 %v1227_v42, %v445_v13 }
  0xfb   :  { %v991_v14 = vpack.c.bf16 %v483_v10, %v481_v8  ;;  %v1031_v15 = vpack.c.bf16 %v523_v11, %v521_v9 }
  0xfd   :  { %1067 = vst [vmem:[#allocation7 + $0xa0] sm:$0xff] %v991_v14  }
  0xfe   :  { %1075 = vst [vmem:[#allocation7 + $0xe0] sm:$0xff] %v1031_v15  }
 0x100   :  { %v485_v16 = vpop.f32.mrf.mxu2  ;;  %v525_v17 = vpop.f32.mrf.mxu3 }
 0x101   :  { %v407_v18 = vpop.f32.mrf.mxu0  ;;  %v447_v19 = vpop.f32.mrf.mxu1  ;;  %v486_v28 = vadd.f32 %v1227_v42, %v485_v16  ;;  %v526_v29 = vadd.f32 %v1227_v42, %v525_v17 }
 0x102   :  { %v408_v22 = vadd.f32 %v1227_v42, %v407_v18  ;;  %v448_v23 = vadd.f32 %v1227_v42, %v447_v19 }
 0x104   :  { %v916_v24 = vpack.c.bf16 %v408_v22, %v406_v20  ;;  %v956_v25 = vpack.c.bf16 %v448_v23, %v446_v21 }
 0x106   :  { %1052 = vst [vmem:[#allocation7 + $0x28] sm:$0xff] %v916_v24  }
 0x107   :  { %1060 = vst [vmem:[#allocation7 + $0x68] sm:$0xff] %v956_v25  }
 0x108   :  { %v487_v26 = vpop.f32.mrf.mxu2  ;;  %v527_v27 = vpop.f32.mrf.mxu3 }
 0x109   :  { %v488_v30 = vadd.f32 %v1227_v42, %v487_v26  ;;  %v528_v31 = vadd.f32 %v1227_v42, %v527_v27  ;;  %v410_v32 = vpop.f32.mrf.mxu0  ;;  %v450_v33 = vpop.f32.mrf.mxu1 }
 0x10a   :  { %v411_v40 = vadd.f32 %v1227_v42, %v410_v32  ;;  %v451_v41 = vadd.f32 %v1227_v42, %v450_v33 }
 0x10b   :  { %v996_v34 = vpack.c.bf16 %v488_v30, %v486_v28  ;;  %v1036_v35 = vpack.c.bf16 %v528_v31, %v526_v29 }
 0x10d   :  { %1068 = vst [vmem:[#allocation7 + $0xa8] sm:$0xff] %v996_v34  }
 0x10e   :  { %1076 = vst [vmem:[#allocation7 + $0xe8] sm:$0xff] %v1036_v35  }
 0x110   :  { %v490_v36 = vpop.f32.mrf.mxu2  ;;  %v530_v37 = vpop.f32.mrf.mxu3 }
 0x111   :  { %v412_v38 = vpop.f32.mrf.mxu0  ;;  %v452_v39 = vpop.f32.mrf.mxu1  ;;  %v491_v49 = vadd.f32 %v1227_v42, %v490_v36  ;;  %v531_v50 = vadd.f32 %v1227_v42, %v530_v37 }
 0x112   :  { %v413_v43 = vadd.f32 %v1227_v42, %v412_v38  ;;  %v453_v44 = vadd.f32 %v1227_v42, %v452_v39 }
 0x114   :  { %v921_v45 = vpack.c.bf16 %v413_v43, %v411_v40  ;;  %v961_v46 = vpack.c.bf16 %v453_v44, %v451_v41 }
 0x116   :  { %1053 = vst [vmem:[#allocation7 + $0x30] sm:$0xff] %v921_v45  }
 0x117   :  { %1061 = vst [vmem:[#allocation7 + $0x70] sm:$0xff] %v961_v46  }
 0x118   :  { %v492_v47 = vpop.f32.mrf.mxu2  ;;  %v532_v48 = vpop.f32.mrf.mxu3 }
 0x119   :  { %v493_v51 = vadd.f32 %v1227_v42, %v492_v47  ;;  %v533_v52 = vadd.f32 %v1227_v42, %v532_v48  ;;  %v415_v53 = vpop.f32.mrf.mxu0  ;;  %v455_v54 = vpop.f32.mrf.mxu1 }
 0x11a   :  { %v416_v61 = vadd.f32 %v1227_v42, %v415_v53  ;;  %v456_v62 = vadd.f32 %v1227_v42, %v455_v54 }
 0x11b   :  { %v1001_v55 = vpack.c.bf16 %v493_v51, %v491_v49  ;;  %v1041_v56 = vpack.c.bf16 %v533_v52, %v531_v50 }
 0x11d   :  { %1069 = vst [vmem:[#allocation7 + $0xb0] sm:$0xff] %v1001_v55  }
 0x11e   :  { %1077 = vst [vmem:[#allocation7 + $0xf0] sm:$0xff] %v1041_v56  }
 0x120   :  { %v495_v57 = vpop.f32.mrf.mxu2  ;;  %v535_v58 = vpop.f32.mrf.mxu3 }
 0x121   :  { %v417_v59 = vpop.f32.mrf.mxu0  ;;  %v457_v60 = vpop.f32.mrf.mxu1  ;;  %v496_v5 = vadd.f32 %v1227_v42, %v495_v57  ;;  %v536_v6 = vadd.f32 %v1227_v42, %v535_v58 }
 0x122   :  { %v418_v63 = vadd.f32 %v1227_v42, %v417_v59  ;;  %v458_v0 = vadd.f32 %v1227_v42, %v457_v60 }
 0x124   :  { %v926_v1 = vpack.c.bf16 %v418_v63, %v416_v61  ;;  %v966_v2 = vpack.c.bf16 %v458_v0, %v456_v62 }
 0x126   :  { %1054 = vst [vmem:[#allocation7 + $0x38] sm:$0xff] %v926_v1  }
 0x127   :  { %1062 = vst [vmem:[#allocation7 + $0x78] sm:$0xff] %v966_v2  }
 0x128   :  { %v497_v3 = vpop.f32.mrf.mxu2  ;;  %v537_v4 = vpop.f32.mrf.mxu3 }
 0x129   :  { %v498_v7 = vadd.f32 %v1227_v42, %v497_v3  ;;  %v538_v8 = vadd.f32 %v1227_v42, %v537_v4 }
 0x12b   :  { %v1006_v9 = vpack.c.bf16 %v498_v7, %v496_v5  ;;  %v1046_v10 = vpack.c.bf16 %v538_v8, %v536_v6 }
 0x12d   :  { %1070 = vst [vmem:[#allocation7 + $0xb8] sm:$0xff] %v1006_v9  }
 0x12e   :  { %1078 = vst [vmem:[#allocation7 + $0xf8] sm:$0xff] %v1046_v10  }
 0x12f   :  { %680 = dma.vmem_to_hbm [thread:$0]  %s673_s24, 4096, %s675_s27, [#allocation4], %s1188_s20, %s1188_s20, %s1189_s21  }
 0x130   :  { %1185 = dma.done.wait [#allocation4], 4096  }
 0x131   :  { %1186 = vsyncadd [#allocation4], 4294963200 }
 0x132   :  { %685 = vsyncpa [#allocation3], 1 }
 0x133   :  { %686 = vsyncpa [#allocation6], 1 }
 0x134   :  { %687 = vsyncpa [#allocation4], 1 }

</bundles_post_ra>
